<compile_context>
chip_gen: v5e
topology: v5e:2x2
jax: 0.10.0
libtpu: 0.0.40
codegen_flags: <defaults>
</compile_context>

<pallas_src>
import jax
import jax.numpy as jnp
from jax.experimental import pallas as pl
from jax.experimental.pallas import tpu as pltpu


_MAX_TILE_BYTES = 2 * 1024 * 1024          # 2 MiB/buffer: safe on v5e/v6e (128 MiB VMEM) and v7x (64 MiB)
_LANE_CANDIDATES = (2048, 1024, 512, 256, 128)


def _elementwise_kernel(x_ref, o1_ref, o2_ref, o3_ref, o4_ref):
    x = x_ref[...]
    o1_ref[...] = x + 2.0
    o2_ref[...] = x - 1.0
    o3_ref[...] = x * 3.0
    o4_ref[...] = x * 0.5   # identical to x / 2 for floats (power-of-two divisor)


def pt_module_forward(x):
    """x: float array of any shape (e.g. NCHW). Returns (x+2, x-1, x*3, x/2)."""
    orig_shape = x.shape
    dtype = x.dtype
    if not jnp.issubdtype(dtype, jnp.floating):
        # TODO(synk): torch's `x / 2` on integer inputs is true division (float result);
        # mixed int/float output dtypes are not implemented here.
        raise NotImplementedError("pt_module_forward supports floating dtypes only")

    itemsize = jnp.dtype(dtype).itemsize
    total = int(x.size)
    sublane = max(8, 32 // itemsize)        # 8 for f32, 16 for bf16/f16, 32 for 1-byte types

    # ---- lane width: prefer a zero-copy layout (no pad, no output slicing) ----
    lanes = None
    aligned = False
    for cand in _LANE_CANDIDATES:
        if total % cand == 0:
            lanes, aligned = cand, True
            break
    if lanes is None:
        lanes = 512

    if aligned:
        rows = total // lanes
        x2d = x.reshape(rows, lanes)        # contiguous reshape: no data movement
    else:
        rows = pl.cdiv(total, lanes)
        pad = rows * lanes - total
        x_flat = x.reshape(-1)
        if pad:
            x_flat = jnp.pad(x_flat, (0, pad))
        x2d = x_flat.reshape(rows, lanes)

    # ---- tile rows: keep >= ~8 grid steps before maxing out the tile ----------
    max_tile_rows = max(sublane,
                        (_MAX_TILE_BYTES // (lanes * itemsize)) // sublane * sublane)
    if rows <= sublane:
        tile_rows = rows                    # tiny input: block equals full array rows
    else:
        target = pl.cdiv(rows, 8)           # aim for ~8 grid steps (pipelining + 2-TC sharding)
        target = ((target + sublane - 1) // sublane) * sublane
        tile_rows = min(max_tile_rows, target)

    grid = (pl.cdiv(rows, tile_rows),)      # partial last block handled by Pallas
    spec = pl.BlockSpec((tile_rows, lanes), lambda i: (i, 0))
    out_sds = jax.ShapeDtypeStruct((rows, lanes), dtype)

    tile_bytes = tile_rows * lanes * itemsize
    # 5 refs x 2 buffers each + headroom; stays well under v7x's 64 MiB VMEM.
    vmem_limit = max(16 * 1024 * 1024, 10 * tile_bytes + 8 * 1024 * 1024)

    outs = pl.pallas_call(
        _elementwise_kernel,
        out_shape=(out_sds, out_sds, out_sds, out_sds),
        grid=grid,
        in_specs=[spec],
        out_specs=(spec, spec, spec, spec),
        compiler_params=pltpu.CompilerParams(
            dimension_semantics=("parallel",),   # shard rows across TCs on v7x
            vmem_limit_bytes=vmem_limit,
        ),
        cost_estimate=pl.CostEstimate(
            flops=4 * total,
            transcendentals=0,
            bytes_accessed=5 * total * itemsize,  # 1 read + 4 writes
        ),
    )(x2d)

    if aligned:
        return tuple(o.reshape(orig_shape) for o in outs)
    return tuple(o.reshape(-1)[:total].reshape(orig_shape) for o in outs)


if __name__ == "__main__":
    key = jax.random.PRNGKey(0)
    x = jax.random.normal(key, (2, 4, 16, 16), dtype=jnp.float32)

    fwd = jax.jit(pt_module_forward)

    outs = jax.block_until_ready(fwd(x))
    refs = (x + 2, x - 1, x * 3, x / 2)
    for got, ref in zip(outs, refs):
        assert got.shape == ref.shape and got.dtype == ref.dtype
        assert jnp.allclose(got, ref, atol=1e-6, rtol=1e-6)

    # Also exercise the unaligned (pad + slice) fallback path.
    x_odd = jax.random.normal(jax.random.PRNGKey(1), (3, 5, 7), dtype=jnp.float32)
    outs_odd = jax.block_until_ready(fwd(x_odd))
    refs_odd = (x_odd + 2, x_odd - 1, x_odd * 3, x_odd / 2)
    for got, ref in zip(outs_odd, refs_odd):
        assert got.shape == ref.shape and got.dtype == ref.dtype
        assert jnp.allclose(got, ref, atol=1e-6, rtol=1e-6)

    print("KERNEL_OK")
</pallas_src>

<mosaic_0001>
module attributes {stable_mosaic.version = 11 : i64} {
  func.func @_elementwise_kernel(%arg0: i32, %arg1: memref<1x2048xf32, #tpu.memory_space<vmem>>, %arg2: memref<1x2048xf32, #tpu.memory_space<vmem>>, %arg3: memref<1x2048xf32, #tpu.memory_space<vmem>>, %arg4: memref<1x2048xf32, #tpu.memory_space<vmem>>, %arg5: memref<1x2048xf32, #tpu.memory_space<vmem>>) attributes {dimension_semantics = [#tpu.dimension_semantics<parallel>], iteration_bounds = array<i64: 1>, scalar_prefetch = 0 : i64, scratch_operands = 0 : i64, tpu.core_type = #tpu.core_type<tc>, window_params = [{transform_indices = @transform_0, window_bounds = array<i64: 1, 2048>}, {transform_indices = @transform_1, window_bounds = array<i64: 1, 2048>}, {transform_indices = @transform_2, window_bounds = array<i64: 1, 2048>}, {transform_indices = @transform_3, window_bounds = array<i64: 1, 2048>}, {transform_indices = @transform_4, window_bounds = array<i64: 1, 2048>}]} {
    %c0 = arith.constant 0 : index
    %c0_0 = arith.constant 0 : index
    %0 = vector.load %arg1[%c0, %c0_0] : memref<1x2048xf32, #tpu.memory_space<vmem>>, vector<1x2048xf32>
    %cst = arith.constant 2.000000e+00 : f32
    %1 = vector.broadcast %cst : f32 to vector<1x2048xf32>
    %2 = arith.addf %0, %1 : vector<1x2048xf32>
    %c0_1 = arith.constant 0 : index
    %c0_2 = arith.constant 0 : index
    %3 = vector.load %arg2[%c0_1, %c0_2] : memref<1x2048xf32, #tpu.memory_space<vmem>>, vector<1x2048xf32>
    tpu.vector_store %arg2[%c0_1, %c0_2], %2 {strides = array<i32>} : memref<1x2048xf32, #tpu.memory_space<vmem>>, vector<1x2048xf32>,
    %cst_3 = arith.constant 1.000000e+00 : f32
    %4 = vector.broadcast %cst_3 : f32 to vector<1x2048xf32>
    %5 = arith.subf %0, %4 : vector<1x2048xf32>
    %c0_4 = arith.constant 0 : index
    %c0_5 = arith.constant 0 : index
    %6 = vector.load %arg3[%c0_4, %c0_5] : memref<1x2048xf32, #tpu.memory_space<vmem>>, vector<1x2048xf32>
    tpu.vector_store %arg3[%c0_4, %c0_5], %5 {strides = array<i32>} : memref<1x2048xf32, #tpu.memory_space<vmem>>, vector<1x2048xf32>,
    %cst_6 = arith.constant 3.000000e+00 : f32
    %7 = vector.broadcast %cst_6 : f32 to vector<1x2048xf32>
    %8 = arith.mulf %0, %7 : vector<1x2048xf32>
    %c0_7 = arith.constant 0 : index
    %c0_8 = arith.constant 0 : index
    %9 = vector.load %arg4[%c0_7, %c0_8] : memref<1x2048xf32, #tpu.memory_space<vmem>>, vector<1x2048xf32>
    tpu.vector_store %arg4[%c0_7, %c0_8], %8 {strides = array<i32>} : memref<1x2048xf32, #tpu.memory_space<vmem>>, vector<1x2048xf32>,
    %cst_9 = arith.constant 5.000000e-01 : f32
    %10 = vector.broadcast %cst_9 : f32 to vector<1x2048xf32>
    %11 = arith.mulf %0, %10 : vector<1x2048xf32>
    %c0_10 = arith.constant 0 : index
    %c0_11 = arith.constant 0 : index
    %12 = vector.load %arg5[%c0_10, %c0_11] : memref<1x2048xf32, #tpu.memory_space<vmem>>, vector<1x2048xf32>
    tpu.vector_store %arg5[%c0_10, %c0_11], %11 {strides = array<i32>} : memref<1x2048xf32, #tpu.memory_space<vmem>>, vector<1x2048xf32>,
    return
  }
  func.func @transform_0(%arg0: i32) -> (i32, i32) {
    %c0_i32 = arith.constant 0 : i32
    %c0_i32_0 = arith.constant 0 : i32
    return %arg0, %c0_i32 : i32, i32
  }
  func.func @transform_1(%arg0: i32) -> (i32, i32) {
    %c0_i32 = arith.constant 0 : i32
    %c0_i32_0 = arith.constant 0 : i32
    return %arg0, %c0_i32 : i32, i32
  }
  func.func @transform_2(%arg0: i32) -> (i32, i32) {
    %c0_i32 = arith.constant 0 : i32
    %c0_i32_0 = arith.constant 0 : i32
    return %arg0, %c0_i32 : i32, i32
  }
  func.func @transform_3(%arg0: i32) -> (i32, i32) {
    %c0_i32 = arith.constant 0 : i32
    %c0_i32_0 = arith.constant 0 : i32
    return %arg0, %c0_i32 : i32, i32
  }
  func.func @transform_4(%arg0: i32) -> (i32, i32) {
    %c0_i32 = arith.constant 0 : i32
    %c0_i32_0 = arith.constant 0 : i32
    return %arg0, %c0_i32 : i32, i32
  }
}

</mosaic_0001>

<bundles_post_ra>
// kernel: pt_module_forward.1
= control target key start
LH: loop header
LB: loop body
LE: loop exit
PB: predicated region body
PF: predicated region fallthrough
CT: control target
= control target key end

     0   :  { %s103_s0 = inlined_call_operand.vmem [shape: f32[1,2048], index: 0, kind: input, shape index: {}]   ;;  %s104_s1 = inlined_call_operand.vmem [shape: f32[1,2048], index: 1, kind: output, shape index: {0}]   ;;  %s105_s2 = inlined_call_operand.vmem [shape: f32[1,2048], index: 2, kind: output, shape index: {1}]   ;;  %s106_s3 = inlined_call_operand.vmem [shape: f32[1,2048], index: 3, kind: output, shape index: {2}]   ;;  %s107_s4 = inlined_call_operand.vmem [shape: f32[1,2048], index: 4, kind: output, shape index: {3}]  }
   0x1   :  { %v12_v0 = vld [vmem:[%s103_s0] sm:$0xff]  ;;  %v13_v1 = vld [vmem:[%s103_s0 + $0x8] sm:$0xff] }
   0x2   :  { %v14_v2 = vadd.f32 2.0, %v12_v0  ;;  %v15_v3 = vadd.f32 2.0, %v13_v1  ;;  %v46_v4 = vadd.f32 -1.0, %v12_v0  ;;  %v47_v5 = vadd.f32 -1.0, %v13_v1 }
   0x3   :  { %v22_v6 = vmul.f32 3.0, %v12_v0  ;;  %v23_v7 = vmul.f32 3.0, %v13_v1  ;;  %v26_v8 = vmul.f32 0.5, %v12_v0  ;;  %v27_v9 = vmul.f32 0.5, %v13_v1 }
   0x4   :  { %16 = vst [vmem:[%s104_s1] sm:$0xff] %v14_v2 }
   0x5   :  { %17 = vst [vmem:[%s104_s1 + $0x8] sm:$0xff] %v15_v3 }
   0x6   :  { %20 = vst [vmem:[%s105_s2] sm:$0xff] %v46_v4 }
   0x7   :  { %21 = vst [vmem:[%s105_s2 + $0x8] sm:$0xff] %v47_v5 }
   0x8   :  { %24 = vst [vmem:[%s106_s3] sm:$0xff] %v22_v6 }
   0x9   :  { %25 = vst [vmem:[%s106_s3 + $0x8] sm:$0xff] %v23_v7 }
   0xa   :  { %28 = vst [vmem:[%s107_s4] sm:$0xff] %v26_v8 }
   0xb   :  { %29 = vst [vmem:[%s107_s4 + $0x8] sm:$0xff] %v27_v9 }

</bundles_post_ra>
